<compile_context>
chip_gen: v7x
topology: tpu7x:2x2x1
jax: 0.10.0
libtpu: 0.0.40
codegen_flags: <defaults>
</compile_context>

<pallas_src>
import math

import jax
import jax.numpy as jnp
from jax.experimental import pallas as pl
from jax.experimental.pallas import tpu as pltpu

EPS = 1e-5
_LANE = 128
_MAX_BLOCK_ROWS = 8192                      # per-tile row cap (review: >= 8192)
_DEFAULT_VMEM_CAP = 64 * 1024 * 1024        # conservative fallback = v7x per-TC VMEM


def _vmem_limit_bytes():
    """~75% of physical VMEM: 48 MiB on v7x (64 MiB/TC), 96 MiB on v5e/v6e (128 MiB)."""
    cap = _DEFAULT_VMEM_CAP
    try:
        info = pltpu.get_tpu_info()
        cap = int(getattr(info, "vmem_capacity_bytes", cap) or cap)
    except Exception:
        pass
    return (3 * cap) // 4


def _make_ln_kernel(has_bias: bool, folded: bool, inv_d: float):
    """Build a LayerNorm kernel specialized for (bias?, lane-folded?)."""

    def kernel(*refs):
        if folded and has_bias:
            x_ref, w_ref, b_ref, s_ref, o_ref = refs
        elif folded:
            x_ref, w_ref, s_ref, o_ref = refs
            b_ref = None
        elif has_bias:
            x_ref, w_ref, b_ref, o_ref = refs
        else:
            x_ref, w_ref, o_ref = refs
            b_ref = None

        x = x_ref[...].astype(jnp.float32)          # (tm, d_lane)
        w = w_ref[...].astype(jnp.float32)          # (1, d_lane), resident

        if folded:
            # Each 128-lane row packs f rows of width D.  seg is the (128,128)
            # block-diagonal "same-segment" matrix, so x @ seg broadcasts each
            # segment's sum back to its own lanes (MXU reduction, lane-dense I/O).
            seg = s_ref[...]
            mean = jnp.dot(x, seg, preferred_element_type=jnp.float32) * inv_d
            xc = x - mean
            var = jnp.dot(xc * xc, seg, preferred_element_type=jnp.float32) * inv_d
        else:
            mean = jnp.mean(x, axis=-1, keepdims=True)
            xc = x - mean
            var = jnp.mean(xc * xc, axis=-1, keepdims=True)   # biased var == F.layer_norm

        y = xc * jax.lax.rsqrt(var + EPS) * w
        if has_bias:
            y = y + b_ref[...].astype(jnp.float32)
        o_ref[...] = y.astype(o_ref.dtype)

    return kernel


def layer_norm(x, weight, bias=None, *, block_rows=None):
    """LayerNorm over the last dim of x.  weight: (D,), bias: (D,) or None."""
    orig_shape = x.shape
    D = orig_shape[-1]
    rows = math.prod(orig_shape[:-1])
    has_bias = bias is not None

    # Lane-dense folding for narrow hidden dims (e.g. D=32 -> 4 rows / 128 lanes).
    fold = (D < _LANE) and (_LANE % D == 0) and (rows % (_LANE // D) == 0)
    # TODO(synk): for awkward D (e.g. 96, 192) or rows % f != 0, a pad-to-128
    # path would keep stores unmasked, but wrapper-side pad/slice adds an
    # x-sized HBM copy that outweighs the vst win; pad upstream instead.
    if fold:
        f = _LANE // D
        d_lane = _LANE
        n_rows = rows // f
        x2 = x.reshape(n_rows, d_lane)               # contiguous reshape: no HBM copy
        w2 = jnp.tile(weight.reshape(1, D), (1, f))
        b2 = jnp.tile(bias.reshape(1, D), (1, f)) if has_bias else None
        lane_seg = jnp.arange(_LANE, dtype=jnp.int32) // D
        seg_mat = (lane_seg[:, None] == lane_seg[None, :]).astype(jnp.float32)
    else:
        d_lane = D
        n_rows = rows
        x2 = x.reshape(n_rows, D)
        w2 = weight.reshape(1, D)
        b2 = bias.reshape(1, D) if has_bias else None
        seg_mat = None

    itemsize = jnp.dtype(x.dtype).itemsize
    sub_mult = max(8, 32 // itemsize)            # sublane packing: 8 f32, 16 bf16, 32 int8
    vmem_limit = _vmem_limit_bytes()

    if block_rows is None:
        # Per-row VMEM cost: 2x double-buffered input tile + 2x output tile in
        # the native dtype, plus ~3 full-tile f32 intermediates (upcast /
        # centered / scaled).  Counting the f32 scratch matters for bf16/fp8
        # inputs on v7x's 64 MiB VMEM.
        per_row_bytes = d_lane * (4 * itemsize + 3 * 4)
        tm = int(vmem_limit * 0.75) // max(1, per_row_bytes)
        tm = min(tm, _MAX_BLOCK_ROWS)
    else:
        tm = block_rows
    tm = max(sub_mult, (tm // sub_mult) * sub_mult)
    if n_rows <= tm:
        if n_rows >= 2 * sub_mult:
            # Keep >= 2 grid steps: v7x's two TensorCores split the "parallel"
            # rows axis, and DMA/compute double-buffering stays engaged.
            tm = pl.cdiv(pl.cdiv(n_rows, 2), sub_mult) * sub_mult
        else:
            tm = n_rows                          # single block == full dims (legal)
    grid = (pl.cdiv(n_rows, tm),)                # partial last block masked by Pallas

    kernel = _make_ln_kernel(has_bias, fold, 1.0 / D)

    in_specs = [
        pl.BlockSpec((tm, d_lane), lambda i: (i, 0)),
        pl.BlockSpec((1, d_lane), lambda i: (0, 0)),   # params: same block every step
    ]
    args = [x2, w2]
    if has_bias:
        in_specs.append(pl.BlockSpec((1, d_lane), lambda i: (0, 0)))
        args.append(b2)
    if fold:
        in_specs.append(pl.BlockSpec((_LANE, _LANE), lambda i: (0, 0)))
        args.append(seg_mat)

    out = pl.pallas_call(
        kernel,
        out_shape=jax.ShapeDtypeStruct((n_rows, d_lane), x.dtype),
        grid_spec=pltpu.PrefetchScalarGridSpec(
            num_scalar_prefetch=0,
            grid=grid,
            in_specs=in_specs,
            out_specs=pl.BlockSpec((tm, d_lane), lambda i: (i, 0)),
        ),
        compiler_params=pltpu.CompilerParams(
            dimension_semantics=("parallel",),
            vmem_limit_bytes=vmem_limit,
        ),
    )(*args)

    return out.reshape(orig_shape)


if __name__ == "__main__":
    key = jax.random.PRNGKey(0)

    def ref_ln(x, w, b):
        xf = x.astype(jnp.float32)
        mean = jnp.mean(xf, axis=-1, keepdims=True)
        var = jnp.mean((xf - mean) ** 2, axis=-1, keepdims=True)
        y = (xf - mean) * jax.lax.rsqrt(var + EPS) * w.astype(jnp.float32)
        if b is not None:
            y = y + b.astype(jnp.float32)
        return y

    # Case 1: module-shaped example (batch=2, seq=8, hidden=32) -> folded,
    # lane-dense path; n_rows=16 also exercises the >=2-step grid split.
    B, T, D = 2, 8, 32
    k1, k2, k3 = jax.random.split(key, 3)
    x = jax.random.normal(k1, (B, T, D), dtype=jnp.float32)
    weight = jnp.ones((D,), dtype=jnp.float32)   # matches nn.Parameter(torch.ones(ndim))
    bias = jnp.zeros((D,), dtype=jnp.float32)    # matches torch.zeros(ndim) (bias=True)

    y = layer_norm(x, weight, bias)
    jax.block_until_ready(y)
    assert jnp.allclose(y, ref_ln(x, weight, bias), atol=1e-4, rtol=1e-4)

    y_nb = layer_norm(x, weight, None)           # bias=False variant (no-bias kernel)
    jax.block_until_ready(y_nb)
    assert jnp.allclose(y_nb, ref_ln(x, weight, None), atol=1e-4, rtol=1e-4)

    # Case 2: lane-wide hidden dim + ragged row count -> plain path, cdiv grid
    # with a masked partial last block (rows=20, tm=8 -> 3 grid steps).
    D2 = 256
    x_big = jax.random.normal(k2, (5, 4, D2), dtype=jnp.float32)
    w_big = jax.random.normal(jax.random.PRNGKey(1), (D2,), dtype=jnp.float32)
    b_big = jax.random.normal(jax.random.PRNGKey(2), (D2,), dtype=jnp.float32)
    y_big = layer_norm(x_big, w_big, b_big, block_rows=8)
    jax.block_until_ready(y_big)
    assert jnp.allclose(y_big, ref_ln(x_big, w_big, b_big), atol=1e-4, rtol=1e-4)

    # Case 3: bf16 input -> 16-row sublane alignment, auto-sized tiles, 2-step grid.
    x_bf = jax.random.normal(k3, (4, 8, D2), dtype=jnp.float32).astype(jnp.bfloat16)
    y_bf = layer_norm(x_bf, w_big, b_big)
    jax.block_until_ready(y_bf)
    assert jnp.allclose(y_bf.astype(jnp.float32), ref_ln(x_bf, w_big, b_big),
                        atol=3e-2, rtol=3e-2)

    print("KERNEL_OK")
</pallas_src>

<mosaic_0001>
module attributes {stable_mosaic.version = 11 : i64} {
  func.func @kernel(%arg0: i32, %arg1: memref<4x128xf32, #tpu.memory_space<vmem>>, %arg2: memref<1x128xf32, #tpu.memory_space<vmem>>, %arg3: memref<1x128xf32, #tpu.memory_space<vmem>>, %arg4: memref<128x128xf32, #tpu.memory_space<vmem>>, %arg5: memref<4x128xf32, #tpu.memory_space<vmem>>) attributes {dimension_semantics = [#tpu.dimension_semantics<parallel>], iteration_bounds = array<i64: 1>, scalar_prefetch = 0 : i64, scratch_operands = 0 : i64, tpu.core_type = #tpu.core_type<tc>, window_params = [{transform_indices = @transform_0, window_bounds = array<i64: 4, 128>}, {pipeline_mode = #tpu.pipeline_mode<synchronous>, transform_indices = @transform_1, window_bounds = array<i64: 1, 128>}, {pipeline_mode = #tpu.pipeline_mode<synchronous>, transform_indices = @transform_2, window_bounds = array<i64: 1, 128>}, {pipeline_mode = #tpu.pipeline_mode<synchronous>, transform_indices = @transform_3, window_bounds = array<i64: 128, 128>}, {transform_indices = @transform_4, window_bounds = array<i64: 4, 128>}]} {
    %c0 = arith.constant 0 : index
    %c0_0 = arith.constant 0 : index
    %0 = vector.load %arg1[%c0, %c0_0] : memref<4x128xf32, #tpu.memory_space<vmem>>, vector<4x128xf32>
    %c0_1 = arith.constant 0 : index
    %c0_2 = arith.constant 0 : index
    %1 = vector.load %arg2[%c0_1, %c0_2] : memref<1x128xf32, #tpu.memory_space<vmem>>, vector<1x128xf32>
    %c0_3 = arith.constant 0 : index
    %c0_4 = arith.constant 0 : index
    %2 = vector.load %arg4[%c0_3, %c0_4] : memref<128x128xf32, #tpu.memory_space<vmem>>, vector<128x128xf32>
    %cst = arith.constant dense<0.000000e+00> : vector<4x128xf32>
    %3 = tpu.matmul %0, %2, %cst {dimension_numbers = #tpu.dot_dimension_numbers<[1], [0], [0], [1], [0, 0, 1, 1], [], []>} : vector<4x128xf32>, vector<128x128xf32>, vector<4x128xf32> -> vector<4x128xf32>
    %cst_5 = arith.constant 3.125000e-02 : f32
    %4 = vector.broadcast %cst_5 : f32 to vector<4x128xf32>
    %5 = arith.mulf %3, %4 : vector<4x128xf32>
    %6 = arith.subf %0, %5 : vector<4x128xf32>
    %7 = arith.mulf %6, %6 : vector<4x128xf32>
    %cst_6 = arith.constant dense<0.000000e+00> : vector<4x128xf32>
    %8 = tpu.matmul %7, %2, %cst_6 {dimension_numbers = #tpu.dot_dimension_numbers<[1], [0], [0], [1], [0, 0, 1, 1], [], []>} : vector<4x128xf32>, vector<128x128xf32>, vector<4x128xf32> -> vector<4x128xf32>
    %cst_7 = arith.constant 3.125000e-02 : f32
    %9 = vector.broadcast %cst_7 : f32 to vector<4x128xf32>
    %10 = arith.mulf %8, %9 : vector<4x128xf32>
    %cst_8 = arith.constant 9.99999974E-6 : f32
    %11 = vector.broadcast %cst_8 : f32 to vector<4x128xf32>
    %12 = arith.addf %10, %11 : vector<4x128xf32>
    %13 = math.rsqrt %12 : vector<4x128xf32>
    %14 = arith.mulf %6, %13 : vector<4x128xf32>
    %15 = vector.broadcast %1 : vector<1x128xf32> to vector<4x128xf32>
    %16 = arith.mulf %14, %15 : vector<4x128xf32>
    %c0_9 = arith.constant 0 : index
    %c0_10 = arith.constant 0 : index
    %17 = vector.load %arg3[%c0_9, %c0_10] : memref<1x128xf32, #tpu.memory_space<vmem>>, vector<1x128xf32>
    %18 = vector.broadcast %17 : vector<1x128xf32> to vector<4x128xf32>
    %19 = arith.addf %16, %18 : vector<4x128xf32>
    %c0_11 = arith.constant 0 : index
    %c0_12 = arith.constant 0 : index
    %20 = vector.load %arg5[%c0_11, %c0_12] : memref<4x128xf32, #tpu.memory_space<vmem>>, vector<4x128xf32>
    tpu.vector_store %arg5[%c0_11, %c0_12], %19 {strides = array<i32>} : memref<4x128xf32, #tpu.memory_space<vmem>>, vector<4x128xf32>,
    return
  }
  func.func @transform_0(%arg0: i32) -> (i32, i32) {
    %c0_i32 = arith.constant 0 : i32
    %c0_i32_0 = arith.constant 0 : i32
    return %arg0, %c0_i32 : i32, i32
  }
  func.func @transform_1(%arg0: i32) -> (i32, i32) {
    %c0_i32 = arith.constant 0 : i32
    %c0_i32_0 = arith.constant 0 : i32
    %c0_i32_1 = arith.constant 0 : i32
    return %c0_i32, %c0_i32_0 : i32, i32
  }
  func.func @transform_2(%arg0: i32) -> (i32, i32) {
    %c0_i32 = arith.constant 0 : i32
    %c0_i32_0 = arith.constant 0 : i32
    %c0_i32_1 = arith.constant 0 : i32
    return %c0_i32, %c0_i32_0 : i32, i32
  }
  func.func @transform_3(%arg0: i32) -> (i32, i32) {
    %c0_i32 = arith.constant 0 : i32
    %c0_i32_0 = arith.constant 0 : i32
    %c0_i32_1 = arith.constant 0 : i32
    return %c0_i32, %c0_i32_0 : i32, i32
  }
  func.func @transform_4(%arg0: i32) -> (i32, i32) {
    %c0_i32 = arith.constant 0 : i32
    %c0_i32_0 = arith.constant 0 : i32
    return %arg0, %c0_i32 : i32, i32
  }
}

</mosaic_0001>

<bundles_post_ra>
// kernel: tpu_custom_call.1
= control target key start
LH: loop header
LB: loop body
LE: loop exit
PB: predicated region body
PF: predicated region fallthrough
CT: control target
= control target key end

     0   :  { %9 = vsyncpa [#allocation3], 0  ;;  %s559_s0 = inlined_call_operand.hbm [shape: f32[4,128], index: 0, kind: input, shape index: {}]   ;;  %s560_s1 = inlined_call_operand.vmem [shape: f32[1,128], index: 1, kind: input, shape index: {}]   ;;  %s561_s2 = inlined_call_operand.vmem [shape: f32[1,128], index: 2, kind: input, shape index: {}]   ;;  %s562_s3 = inlined_call_operand.hbm [shape: f32[128,128], index: 3, kind: input, shape index: {}]   ;;  %s563_s4 = inlined_call_operand.hbm [shape: f32[4,128], index: 4, kind: output, shape index: {}]  }
   0x1   :  { %10 = vsyncpa [#allocation6], 0 }
   0x2   :  { %11 = vsyncpa [#allocation4], 0  ;;  %s477_s15 = smov [#allocation2]   ;;  %s478_s17 = smov [#allocation5]  }
   0x3   :  { %s18_s16 = sshll.u32 %s477_s15, 4  ;;  %s31_s18 = sshll.u32 %s478_s17, 4  ;;  %s19_s16 = int_to_ptr.vmem [resolvable:$true] %s18_s16  ;;  %s510_s18 = int_to_ptr.vmem [resolvable:$true] %s31_s18 }
   0x4   :  { %s405_s21 = scalar_lea.hbm %s559_s0, 64 }
   0x5   :  { %p406_p0 = scmp.ne.s32.totalorder %s559_s0, %s405_s21  ;;  %p409_p1 = scmp.lt.u32.totalorder %s405_s21, %s559_s0 }
   0x7   :  { %p411_p2 = pnand %p409_p1, %p406_p0 }
   0x9   :  { %414 = shalt.err (!%p411_p2)
}
   0xa   :  { %s415_s26 = scalar_lea.vmem %s19_s16, 64  ;;  %p420_p4 = scmp.lt.s32.totalorder %s19_s16, %s19_s16 }
   0xb   :  { %p416_p3 = scmp.ne.s32.totalorder %s19_s16, %s415_s26  ;;  %p421_p5 = scmp.lt.s32.totalorder %s415_s26, %s415_s26 }
   0xd   :  { %p422_p6 = por %p421_p5, %p420_p4 }
   0xf   :  { %p423_p7 = pnand %p422_p6, %p416_p3 }
  0x11   :  { %426 = shalt.err (!%p423_p7)
}
  0x12   :  { %21 = dma.hbm_to_vmem [thread:$0]  %s559_s0, 64, %s19_s16, [#allocation3]  }
  0x13   :  { %s427_s5 = scalar_lea.hbm %s562_s3, 2048 }
  0x14   :  { %p428_p8 = scmp.ne.s32.totalorder %s562_s3, %s427_s5  ;;  %p431_p9 = scmp.lt.u32.totalorder %s427_s5, %s562_s3 }
  0x16   :  { %p433_p10 = pnand %p431_p9, %p428_p8 }
  0x18   :  { %436 = shalt.err (!%p433_p10)
}
  0x19   :  { %s437_s10 = scalar_lea.vmem %s510_s18, 2048  ;;  %p442_p12 = scmp.lt.s32.totalorder %s510_s18, %s510_s18 }
  0x1a   :  { %p438_p11 = scmp.ne.s32.totalorder %s510_s18, %s437_s10  ;;  %p443_p13 = scmp.lt.s32.totalorder %s437_s10, %s437_s10 }
  0x1c   :  { %p444_p0 = por %p443_p13, %p442_p12 }
  0x1e   :  { %p445_p1 = pnand %p444_p0, %p438_p11 }
  0x20   :  { %448 = shalt.err (!%p445_p1)
}
  0x21   :  { %s479_s0 = smov 128   ;;  %s480_s11 = smov 8  }
  0x22   :  { %37 = dma.hbm_to_vmem [thread:$0]  %s562_s3, 2048, %s510_s18, [#allocation6], %s479_s0, %s479_s0, %s480_s11  }
  0x23   :  { %471 = dma.done.wait [#allocation3], 64  }
  0x24   :  { %472 = vsyncadd [#allocation3], 4294967232 }
  0x25   :  { %473 = dma.done.wait [#allocation6], 2048  }
  0x26   :  { %474 = vsyncadd [#allocation6], 4294965248  ;;  %v481_v0 = vmov 0.0|0.0   ;;  %vm482_vm0 = vmmov 0   ;;  %v483_v1 = vmov 0.0   ;;  %v46_v2 = vld [vmem:[#allocation5] sm:$0xff] }
  0x27   :  { %347 = vmatprep.subr.bf16.mxu0 %v481_v0  ;;  %309 = vmatprep.mubr.msk.f32.mxu0 %vm482_vm0, %v483_v1  ;;  %v47_v3 = vld [vmem:[#allocation5 + $0x8] sm:$0xff]  ;;  %v48_v4 = vld [vmem:[#allocation5 + $0x10] sm:$0xff]  ;;  %v49_v6 = vld [vmem:[#allocation5 + $0x18] sm:$0xff]  ;;  %s484_s17 = smov [#allocation7]  }
  0x28   :  { %371 = vmatprep.subr.bf16.mxu1 %v481_v0  ;;  %344 = vmatprep.mubr.msk.f32.mxu1 %vm482_vm0, %v483_v1  ;;  %v348_v5 = vpack.c.bf16 %v47_v3, %v46_v2  ;;  %v351_v7 = vpack.c.bf16 %v49_v6, %v48_v4  ;;  %v50_v8 = vld [vmem:[#allocation5 + $0x20] sm:$0xff]  ;;  %v51_v9 = vld [vmem:[#allocation5 + $0x28] sm:$0xff]  ;;  %v52_v11 = vld [vmem:[#allocation5 + $0x30] sm:$0xff]  ;;  %s231_s18 = sshll.u32 %s484_s17, 4  ;;  %s232_s18 = int_to_ptr.vmem [resolvable:$true] %s231_s18 }
  0x29   :  { %v354_v10 = vpack.c.bf16 %v51_v9, %v50_v8  ;;  %v53_v12 = vld [vmem:[#allocation5 + $0x38] sm:$0xff]  ;;  %v54_v14 = vld [vmem:[#allocation5 + $0x40] sm:$0xff]  ;;  %v55_v15 = vld [vmem:[#allocation5 + $0x48] sm:$0xff]  ;;  %s449_s19 = scalar_lea.vmem %s232_s18, 64  ;;  %p454_p3 = scmp.lt.s32.totalorder %s232_s18, %s232_s18 }
  0x2a   :  { %349 = vmatpush3.bf16.msra.mxu0 %v348_v5  ;;  %373 = vmatpush3.bf16.msra.mxu1 %v348_v5  ;;  %v357_v13 = vpack.c.bf16 %v53_v12, %v52_v11  ;;  %v360_v16 = vpack.c.bf16 %v55_v15, %v54_v14  ;;  %v56_v17 = vld [vmem:[#allocation5 + $0x50] sm:$0xff]  ;;  %v57_v18 = vld [vmem:[#allocation5 + $0x58] sm:$0xff]  ;;  %v58_v20 = vld [vmem:[#allocation5 + $0x60] sm:$0xff]  ;;  %p450_p2 = scmp.ne.s32.totalorder %s232_s18, %s449_s19  ;;  %p455_p4 = scmp.lt.s32.totalorder %s449_s19, %s449_s19 }
  0x2b   :  { %350 = vmatprep.subr.bf16.mxu0 %v481_v0  ;;  %374 = vmatprep.subr.bf16.mxu1 %v481_v0  ;;  %v363_v19 = vpack.c.bf16 %v57_v18, %v56_v17  ;;  %v59_v21 = vld [vmem:[#allocation5 + $0x68] sm:$0xff]  ;;  %v60_v23 = vld [vmem:[#allocation5 + $0x70] sm:$0xff]  ;;  %v61_v24 = vld [vmem:[#allocation5 + $0x78] sm:$0xff] }
  0x2c   :  { %v366_v22 = vpack.c.bf16 %v59_v21, %v58_v20  ;;  %v369_v25 = vpack.c.bf16 %v61_v24, %v60_v23  ;;  %v44_v26 = vld [vmem:[#allocation2] sm:$0xf]  ;;  %p456_p5 = por %p455_p4, %p454_p3 }
  0x2d   :  { %v241_v37 = vld [vmem:[%s560_s1] ss:$0 sm:$0xff] }
  0x2e   :  { %352 = vmatpush3.bf16.msra.mxu0 %v351_v7  ;;  %376 = vmatpush3.bf16.msra.mxu1 %v351_v7  ;;  %v242_v39 = vld [vmem:[%s561_s2] ss:$0 sm:$0xff]  ;;  %p457_p6 = pnand %p456_p5, %p450_p2 }
  0x2f   :  { %353 = vmatprep.subr.bf16.mxu0 %v481_v0  ;;  %377 = vmatprep.subr.bf16.mxu1 %v481_v0 }
  0x32   :  { %355 = vmatpush3.bf16.msra.mxu0 %v354_v10  ;;  %379 = vmatpush3.bf16.msra.mxu1 %v354_v10 }
  0x33   :  { %356 = vmatprep.subr.bf16.mxu0 %v481_v0  ;;  %380 = vmatprep.subr.bf16.mxu1 %v481_v0 }
  0x36   :  { %358 = vmatpush3.bf16.msra.mxu0 %v357_v13  ;;  %382 = vmatpush3.bf16.msra.mxu1 %v357_v13 }
  0x37   :  { %359 = vmatprep.subr.bf16.mxu0 %v481_v0  ;;  %383 = vmatprep.subr.bf16.mxu1 %v481_v0 }
  0x3a   :  { %361 = vmatpush3.bf16.msra.mxu0 %v360_v16  ;;  %385 = vmatpush3.bf16.msra.mxu1 %v360_v16 }
  0x3b   :  { %362 = vmatprep.subr.bf16.mxu0 %v481_v0  ;;  %386 = vmatprep.subr.bf16.mxu1 %v481_v0 }
  0x3e   :  { %364 = vmatpush3.bf16.msra.mxu0 %v363_v19  ;;  %388 = vmatpush3.bf16.msra.mxu1 %v363_v19 }
  0x3f   :  { %365 = vmatprep.subr.bf16.mxu0 %v481_v0  ;;  %389 = vmatprep.subr.bf16.mxu1 %v481_v0 }
  0x42   :  { %367 = vmatpush3.bf16.msra.mxu0 %v366_v22  ;;  %391 = vmatpush3.bf16.msra.mxu1 %v366_v22 }
  0x43   :  { %368 = vmatprep.subr.bf16.mxu0 %v481_v0  ;;  %392 = vmatprep.subr.bf16.mxu1 %v481_v0 }
  0x46   :  { %370 = vmatpush3.bf16.msra.mxu0 %v369_v25  ;;  %394 = vmatpush3.bf16.msra.mxu1 %v369_v25 }
  0x49   :  { %310 = vmatmul.mubr.f32.vlgmr.msra.gmra.mrb[0].mxu0 %v44_v26 }
 0x11c   :  { %v128_v27 = vpop.f32.mrb[0].mxu0 }
 0x11d   :  { %v132_v28 = vmul.f32 0.03125, %v128_v27  ;;  %v311_v29 = vpop.f32.mrb[1].mxu0 }
 0x11f   :  { %v133_v30 = vsub.f32 %v44_v26, %v132_v28 }
 0x121   :  { %v134_v31 = vmul.f32 %v133_v30, %v133_v30 }
 0x123   :  { %345 = vmatmul.mubr.f32.vlgmr.msra.gmra.mrb[0].mxu1 %v134_v31 }
 0x1f6   :  { %v201_v32 = vpop.f32.mrb[0].mxu1 }
 0x1f7   :  { %v205_v33 = vmul.f32 0.03125, %v201_v32  ;;  %v346_v34 = vpop.f32.mrb[1].mxu1 }
 0x1f9   :  { %v206_v35 = vadd.f32 1e-05, %v205_v33 }
 0x1fb   :  { %403 = vrsqrt.f32 %v206_v35 }
 0x205   :  { %v404_v36 = vpop.eup %403 }
 0x206   :  { %v208_v38 = vmul.f32 %v404_v36, %v133_v30 }
 0x208   :  { %v215_v40 = vmul.f32 %v241_v37, %v208_v38 }
 0x20a   :  { %v223_v41 = vadd.f32 %v242_v39, %v215_v40 }
 0x20c   :  { %224 = vst [vmem:[#allocation7] sm:$0xf] %v223_v41 }
 0x20d   :  { %460 = shalt.err (!%p457_p6)
}
 0x20e   :  { %s461_s21 = scalar_lea.hbm %s563_s4, 64 }
 0x20f   :  { %p462_p7 = scmp.ne.s32.totalorder %s563_s4, %s461_s21  ;;  %p465_p8 = scmp.lt.u32.totalorder %s461_s21, %s563_s4 }
 0x211   :  { %p467_p9 = pnand %p465_p8, %p462_p7 }
 0x213   :  { %470 = shalt.err (!%p467_p9)
}
 0x214   :  { %234 = dma.vmem_to_hbm [thread:$0]  %s232_s18, 64, %s563_s4, [#allocation4]  }
 0x215   :  { %475 = dma.done.wait [#allocation4], 64  }
 0x216   :  { %476 = vsyncadd [#allocation4], 4294967232 }
 0x217   :  { %238 = vsyncpa [#allocation3], 1 }
 0x218   :  { %239 = vsyncpa [#allocation6], 1 }
 0x219   :  { %240 = vsyncpa [#allocation4], 1 }

</bundles_post_ra>
